<compile_context>
chip_gen: v6e
topology: v6e:2x2x1
jax: 0.10.0
libtpu: 0.0.40
codegen_flags: <defaults>
</compile_context>

<pallas_src>
import functools
import math

import jax
import jax.numpy as jnp
from jax.experimental import pallas as pl
from jax.experimental.pallas import tpu as pltpu


def _round_up(x, m):
    return (x + m - 1) // m * m


def _cdiv(a, b):
    return (a + b - 1) // b


# ----------------------------------------------------------------------------
# Pallas kernel 1: single-layer LSTM (input_size = 1), returns last hidden state.
# Transposed layout: batch on lanes, gates/hidden on sublanes.
# ----------------------------------------------------------------------------
def _lstm_last_h_kernel(x_ref, wih_ref, whh_ref, b_ref, out_ref):
    # x_ref  : (T, bn)     time on sublanes, batch*clients on lanes
    # wih_ref: (4Hp, 1)    input->gate weights (input_size == 1), gate order (i,f,o,g)
    # whh_ref: (4Hp, Hp)   hidden->gate weights, native PyTorch orientation (no .T)
    # b_ref  : (4Hp, 1)    b_ih + b_hh
    # out_ref: (Hp, bn)    h_T  (lane-dense output block)
    T = x_ref.shape[0]
    Hp = out_ref.shape[0]
    bn = out_ref.shape[-1]

    x = x_ref[...]
    wih = wih_ref[...]
    whh = whh_ref[...]
    b = b_ref[...]

    h = jnp.zeros((Hp, bn), jnp.float32)
    c = jnp.zeros((Hp, bn), jnp.float32)

    # T (= window_size) is a small static int -> unrolled Python loop.
    # TODO(synk): switch to lax.fori_loop(..., unroll=4) if window_size grows >~32.
    for t in range(T):
        # Input contribution computed in-loop (cheap VPU broadcast mul+add that
        # sits off the serial matmul->EUP chain).  Pre-materializing all T of
        # these (4Hp, bn) slabs blew the 64-vreg file and caused spills.
        inp = wih * x[t:t + 1, :] + b                                       # (4Hp, bn)
        gates = jnp.dot(whh, h, preferred_element_type=jnp.float32) + inp   # (4Hp, bn)
        # Gate rows pre-permuted to (i, f, o, g): one full-width sigmoid slab +
        # one tanh slab instead of four quarter-width activations.
        sig = jax.nn.sigmoid(gates[:3 * Hp, :])      # (3Hp, bn)
        g = jnp.tanh(gates[3 * Hp:, :])              # (Hp, bn)
        i = sig[:Hp, :]
        f = sig[Hp:2 * Hp, :]
        o = sig[2 * Hp:3 * Hp, :]
        c = f * c + i * g
        h = o * jnp.tanh(c)

    out_ref[...] = h.astype(out_ref.dtype)


def lstm_last_hidden(x_seq, w_ih, w_hh, b_ih, b_hh, *, block_n=256):
    """x_seq: (N, T) f32.  Returns (N, H) = final hidden state (PyTorch LSTM semantics)."""
    N, T = x_seq.shape
    H = w_hh.shape[1]                 # w_hh given as (4H, H) like PyTorch
    assert w_ih.shape == (4 * H, 1)

    Hp = _round_up(H, 8)              # pad gate blocks to sublane multiples

    def _regroup(p):
        # p: (4H, k) in PyTorch gate order (i, f, g, o)
        # -> (4Hp, k) in (i, f, o, g) order, each gate block zero-padded to Hp rows.
        i, f, g, o = (p[k * H:(k + 1) * H] for k in range(4))
        return jnp.concatenate(
            [jnp.pad(blk, ((0, Hp - H), (0, 0))) for blk in (i, f, o, g)],
            axis=0).astype(jnp.float32)

    wih_col = _regroup(w_ih.reshape(4 * H, 1))                       # (4Hp, 1)
    whh_p = jnp.pad(_regroup(w_hh), ((0, 0), (0, Hp - H)))           # (4Hp, Hp)
    b_col = _regroup((b_ih + b_hh).reshape(4 * H, 1))                # (4Hp, 1)
    # Zero-padded rows/cols keep padded h/c rows exactly 0 for all timesteps.

    # Lane-dense batch blocking: batch*clients on the lane axis.
    Nr = _round_up(N, 128)
    bn = min(_round_up(block_n, 128), Nr)
    # Guarantee >=2 lane blocks when N allows it so the "parallel" grid axis
    # actually shards across v7x's two TensorCores (harmless on v5e/v6e).
    if Nr // bn < 2 and Nr >= 2 * 128:
        bn = _round_up(_cdiv(Nr, 2), 128)
    Np = _round_up(N, bn)

    x_t = jnp.pad(x_seq.astype(jnp.float32).T, ((0, 0), (0, Np - N)))  # (T, Np)

    # NOTE: wih/whh/b blocks are grid-invariant; single-buffering them
    # (pipeline_mode=pl.Buffered(1)) would save a tiny amount of VMEM but is
    # left at the default double-buffering to avoid lowering-version sensitivity.
    out = pl.pallas_call(
        _lstm_last_h_kernel,
        out_shape=jax.ShapeDtypeStruct((Hp, Np), jnp.float32),
        grid_spec=pltpu.PrefetchScalarGridSpec(
            num_scalar_prefetch=0,
            grid=(Np // bn,),
            in_specs=[
                pl.BlockSpec((T, bn), lambda i: (0, i)),
                pl.BlockSpec((4 * Hp, 1), lambda i: (0, 0)),
                pl.BlockSpec((4 * Hp, Hp), lambda i: (0, 0)),
                pl.BlockSpec((4 * Hp, 1), lambda i: (0, 0)),
            ],
            out_specs=pl.BlockSpec((Hp, bn), lambda i: (0, i)),
        ),
        compiler_params=pltpu.CompilerParams(
            dimension_semantics=("parallel",)),   # lane blocks shard across v7x's 2 TCs
    )(x_t, wih_col, whh_p, b_col)

    return out[:H, :N].T                                              # (N, H)


# ----------------------------------------------------------------------------
# Pallas kernel 2: fused q_net MLP  (Linear -> act -> Linear -> act -> Linear).
# ----------------------------------------------------------------------------
def _mish(x):
    # mish(x) = x * tanh(softplus(x)).
    # tanh(log(1+e^x)) = ((1+e^x)^2 - 1)/((1+e^x)^2 + 1) = e^x(e^x+2)/(e^x(e^x+2)+2).
    # -> ONE exp + ONE approx reciprocal (EUP) + VPU muls instead of exp+log+tanh.
    # The e^x*(e^x+2) form avoids the (1+e^x)^2 - 1 cancellation for negative x.
    e = jnp.exp(jnp.minimum(x, 20.0))          # clamp keeps e^x finite in f32
    num = e * (e + 2.0)
    tsp = num * pl.reciprocal(num + 2.0, approx=True)
    return jnp.where(x > 20.0, x, x * tsp)     # softplus(x)->x, tanh->1 for large x


def _qnet_kernel(x_ref, w1_ref, b1_ref, w2_ref, b2_ref, w3_ref, b3_ref, o_ref, *, act):
    a = _mish if act == "mish" else (lambda v: jnp.maximum(v, 0.0))
    wdt = w1_ref.dtype                         # f32 default, bf16 if use_bf16
    x = x_ref[...]
    h = a(jnp.dot(x, w1_ref[...], preferred_element_type=jnp.float32) + b1_ref[...])
    h = a(jnp.dot(h.astype(wdt), w2_ref[...],
                  preferred_element_type=jnp.float32) + b2_ref[...])
    # TODO(synk): the (bb,Hd)@(Hd,1) final layer uses 1/256 of the MXU width and the
    # (bb,1) output block is a masked store; switch to a VPU mul + lane reduction
    # (or a lane-dense (1,bb) output) only if the epilogue shows up in bundle profiles.
    o_ref[...] = (jnp.dot(h.astype(wdt), w3_ref[...], preferred_element_type=jnp.float32)
                  + b3_ref[...]).astype(o_ref.dtype)


def qnet_forward(x, w1, b1, w2, b2, w3, b3, *, activation="mish", block_b=512,
                 use_bf16=False):
    """x: (B, D) f32. Weights stored as (in, out). Returns (B, 1)."""
    B, D = x.shape
    Hd = w1.shape[1]

    Br = _round_up(B, 8)
    bb = min(_round_up(block_b, 8), Br)
    # Guarantee >=2 row blocks when the batch allows it so the "parallel" grid
    # axis actually shards across v7x's two TensorCores (harmless on v5e/v6e).
    if Br // bb < 2 and Br >= 16:
        bb = _round_up(_cdiv(Br, 2), 8)
    Bp = _round_up(B, bb)

    # Optional bf16 matmul operands (v6e/v7x native bf16 MXU); accumulation and
    # biases/activations stay f32 via preferred_element_type.  Default off for
    # tight numerical parity with the PyTorch f32 reference.
    wdt = jnp.bfloat16 if use_bf16 else jnp.float32
    xp = jnp.pad(x.astype(jnp.float32), ((0, Bp - B), (0, 0))).astype(wdt)

    # NOTE: weight/bias blocks are grid-invariant; single-buffering them
    # (pipeline_mode=pl.Buffered(1)) is a minor VMEM hygiene win (~0.26 MiB at
    # Hd=256) left out to avoid lowering-version sensitivity.
    out = pl.pallas_call(
        functools.partial(_qnet_kernel, act=activation),
        out_shape=jax.ShapeDtypeStruct((Bp, 1), jnp.float32),
        grid_spec=pltpu.PrefetchScalarGridSpec(
            num_scalar_prefetch=0,
            grid=(Bp // bb,),
            in_specs=[
                pl.BlockSpec((bb, D), lambda i: (i, 0)),
                pl.BlockSpec((D, Hd), lambda i: (0, 0)),
                pl.BlockSpec((1, Hd), lambda i: (0, 0)),
                pl.BlockSpec((Hd, Hd), lambda i: (0, 0)),
                pl.BlockSpec((1, Hd), lambda i: (0, 0)),
                pl.BlockSpec((Hd, 1), lambda i: (0, 0)),
                pl.BlockSpec((1, 1), lambda i: (0, 0)),
            ],
            out_specs=pl.BlockSpec((bb, 1), lambda i: (i, 0)),
        ),
        compiler_params=pltpu.CompilerParams(
            dimension_semantics=("parallel",)),
    )(xp,
      w1.astype(wdt), b1.reshape(1, Hd).astype(jnp.float32),
      w2.astype(wdt), b2.reshape(1, Hd).astype(jnp.float32),
      w3.astype(wdt), b3.reshape(1, 1).astype(jnp.float32))
    return out[:B]


# ----------------------------------------------------------------------------
# ObsProcessor port (control flow mirrors the PyTorch forward exactly).
# ----------------------------------------------------------------------------
class ObsProcessorPallas:
    def __init__(self, window_size, hidden_size, lstm=False, key=None):
        self.use_lstm = lstm
        self.window_size = window_size
        self.hidden_size = hidden_size
        H = hidden_size
        key = jax.random.PRNGKey(0) if key is None else key
        k0, k1, k2, k3 = jax.random.split(key, 4)
        bound = 1.0 / math.sqrt(H)
        self.w_ih = jax.random.uniform(k0, (4 * H, 1), jnp.float32, -bound, bound)
        self.w_hh = jax.random.uniform(k1, (4 * H, H), jnp.float32, -bound, bound)
        self.b_ih = jax.random.uniform(k2, (4 * H,), jnp.float32, -bound, bound)
        self.b_hh = jax.random.uniform(k3, (4 * H,), jnp.float32, -bound, bound)

    def __call__(self, obs):
        batch_size = clients_num = None
        features = []
        for key in sorted(obs.keys()):
            value = jnp.asarray(obs[key], jnp.float32)
            if batch_size is None:
                batch_size, clients_num = value.shape[0], value.shape[1]
            if value.ndim == 3 and value.shape[-1] == self.window_size:
                if self.use_lstm:
                    seq = value.reshape(batch_size * clients_num, self.window_size)
                    h_last = lstm_last_hidden(
                        seq, self.w_ih, self.w_hh, self.b_ih, self.b_hh)
                    features.append(
                        h_last.reshape(batch_size, clients_num, self.hidden_size))
                else:
                    continue
            else:
                features.append(value[..., None])
        return jnp.concatenate(features, axis=-1)


# ----------------------------------------------------------------------------
# Critic_Q port.
# ----------------------------------------------------------------------------
class CriticQPallas:
    def __init__(self, state_dim, action_dim, hidden_dim=256, activation="mish",
                 use_bf16=False, key=None):
        self.activation = activation
        self.use_bf16 = use_bf16
        key = jax.random.PRNGKey(0) if key is None else key
        k1, k2, k3, k4 = jax.random.split(key, 4)
        d_in = state_dim + action_dim

        def linear_init(k, fan_in, fan_out):
            kw, kb = jax.random.split(k)
            b = 1.0 / math.sqrt(fan_in)
            return (jax.random.uniform(kw, (fan_in, fan_out), jnp.float32, -b, b),
                    jax.random.uniform(kb, (fan_out,), jnp.float32, -b, b))

        self.w1, self.b1 = linear_init(k1, d_in, hidden_dim)
        self.w2, self.b2 = linear_init(k2, hidden_dim, hidden_dim)
        self.w3, self.b3 = linear_init(k3, hidden_dim, 1)
        # Matches the PyTorch module: ObsProcessor(window_size=5, hidden_size=10), lstm=False.
        self.LSTMProcessor = ObsProcessorPallas(window_size=5, hidden_size=10,
                                                lstm=False, key=k4)

    def __call__(self, obs, act):
        obs_feat = self.LSTMProcessor(obs)
        obs_flat = obs_feat.reshape(obs_feat.shape[0], -1)
        act_flat = jnp.asarray(act, jnp.float32).reshape(act.shape[0], -1)
        x = jnp.concatenate([obs_flat, act_flat], axis=1)
        return qnet_forward(x, self.w1, self.b1, self.w2, self.b2, self.w3, self.b3,
                            activation=self.activation, use_bf16=self.use_bf16)


# ----------------------------------------------------------------------------
# Pure-JAX references (for correctness checks).
# ----------------------------------------------------------------------------
def _ref_lstm_last_h(x_seq, w_ih, w_hh, b_ih, b_hh):
    N, T = x_seq.shape
    H = w_hh.shape[1]
    h = jnp.zeros((N, H), jnp.float32)
    c = jnp.zeros((N, H), jnp.float32)
    for t in range(T):
        gates = x_seq[:, t:t + 1] @ w_ih.T + h @ w_hh.T + b_ih + b_hh
        i = jax.nn.sigmoid(gates[:, 0 * H:1 * H])
        f = jax.nn.sigmoid(gates[:, 1 * H:2 * H])
        g = jnp.tanh(gates[:, 2 * H:3 * H])
        o = jax.nn.sigmoid(gates[:, 3 * H:4 * H])
        c = f * c + i * g
        h = o * jnp.tanh(c)
    return h


def _ref_mish(x):
    return x * jnp.tanh(jax.nn.softplus(x))


def _ref_qnet(x, w1, b1, w2, b2, w3, b3):
    h = _ref_mish(x @ w1 + b1)
    h = _ref_mish(h @ w2 + b2)
    return h @ w3 + b3


if __name__ == "__main__":
    batch, clients, window_size = 2, 4, 5
    action_dim = 6

    key = jax.random.PRNGKey(0)
    k_hist, k_cpu, k_mem, k_act, k_model, k_big = jax.random.split(key, 6)
    obs = {
        "history": jax.random.normal(k_hist, (batch, clients, window_size), jnp.float32),
        "cpu": jax.random.uniform(k_cpu, (batch, clients), jnp.float32),
        "mem": jax.random.uniform(k_mem, (batch, clients), jnp.float32),
    }
    act = jax.random.normal(k_act, (batch, action_dim), jnp.float32)

    # Critic_Q: ObsProcessor(lstm=False) keeps only the 2-D keys -> state_dim = 2 * clients.
    state_dim = 2 * clients
    critic = CriticQPallas(state_dim, action_dim, hidden_dim=256, key=k_model)
    q = jax.block_until_ready(critic(obs, act))
    assert q.shape == (batch, 1), q.shape

    # Pure-JAX reference for the full Critic_Q forward.
    obs_feat_ref = jnp.concatenate([obs["cpu"][..., None], obs["mem"][..., None]], axis=-1)
    x_ref = jnp.concatenate([obs_feat_ref.reshape(batch, -1),
                             act.reshape(batch, -1)], axis=1)
    q_ref = _ref_qnet(x_ref, critic.w1, critic.b1, critic.w2, critic.b2,
                      critic.w3, critic.b3)
    # approx reciprocal inside the fused mish -> slightly looser tolerance than exact f32.
    assert jnp.allclose(q, q_ref, atol=2e-3, rtol=2e-3), jnp.max(jnp.abs(q - q_ref))

    # q_net with a batch large enough to exercise the >=2-block (v7x TC-sharding)
    # grid split and row padding.
    x_big = jax.random.normal(k_big, (40, state_dim + action_dim), jnp.float32)
    q_big = jax.block_until_ready(
        qnet_forward(x_big, critic.w1, critic.b1, critic.w2, critic.b2,
                     critic.w3, critic.b3))
    q_big_ref = _ref_qnet(x_big, critic.w1, critic.b1, critic.w2, critic.b2,
                          critic.w3, critic.b3)
    assert jnp.allclose(q_big, q_big_ref, atol=2e-3, rtol=2e-3), \
        jnp.max(jnp.abs(q_big - q_big_ref))

    # Optional bf16 matmul path (v6e/v7x MXU) — looser tolerance.
    q_bf16 = jax.block_until_ready(
        qnet_forward(x_big, critic.w1, critic.b1, critic.w2, critic.b2,
                     critic.w3, critic.b3, use_bf16=True))
    assert jnp.allclose(q_bf16, q_big_ref, atol=5e-2, rtol=5e-2), \
        jnp.max(jnp.abs(q_bf16 - q_big_ref))

    # Exercise the LSTM kernel via the dependent ObsProcessor class (lstm=True).
    proc = ObsProcessorPallas(window_size, hidden_size=10, lstm=True,
                              key=jax.random.PRNGKey(1))
    feat = jax.block_until_ready(proc(obs))
    assert feat.shape == (batch, clients, 1 + 10 + 1), feat.shape
    seq = obs["history"].reshape(batch * clients, window_size)
    ref_h = _ref_lstm_last_h(seq, proc.w_ih, proc.w_hh, proc.b_ih, proc.b_hh)
    feat_ref = jnp.concatenate(
        [obs["cpu"][..., None], ref_h.reshape(batch, clients, 10), obs["mem"][..., None]],
        axis=-1)
    assert jnp.allclose(feat, feat_ref, atol=2e-5, rtol=1e-5), \
        jnp.max(jnp.abs(feat - feat_ref))

    # LSTM with enough rows to exercise the multi-block (>=2 lane blocks) path + padding.
    seq_big = jax.random.normal(jax.random.PRNGKey(2), (260, window_size), jnp.float32)
    h_big = jax.block_until_ready(
        lstm_last_hidden(seq_big, proc.w_ih, proc.w_hh, proc.b_ih, proc.b_hh))
    h_big_ref = _ref_lstm_last_h(seq_big, proc.w_ih, proc.w_hh, proc.b_ih, proc.b_hh)
    assert jnp.allclose(h_big, h_big_ref, atol=2e-5, rtol=1e-5), \
        jnp.max(jnp.abs(h_big - h_big_ref))

    print("KERNEL_OK")
</pallas_src>

<mosaic_0001>
module attributes {stable_mosaic.version = 11 : i64} {
  func.func @_qnet_kernel(%arg0: i32, %arg1: memref<8x14xf32, #tpu.memory_space<vmem>>, %arg2: memref<14x256xf32, #tpu.memory_space<vmem>>, %arg3: memref<1x256xf32, #tpu.memory_space<vmem>>, %arg4: memref<256x256xf32, #tpu.memory_space<vmem>>, %arg5: memref<1x256xf32, #tpu.memory_space<vmem>>, %arg6: memref<256x1xf32, #tpu.memory_space<vmem>>, %arg7: memref<1x1xf32, #tpu.memory_space<vmem>>, %arg8: memref<8x1xf32, #tpu.memory_space<vmem>>) attributes {dimension_semantics = [#tpu.dimension_semantics<parallel>], iteration_bounds = array<i64: 1>, scalar_prefetch = 0 : i64, scratch_operands = 0 : i64, tpu.core_type = #tpu.core_type<tc>, window_params = [{transform_indices = @transform_0, window_bounds = array<i64: 8, 14>}, {pipeline_mode = #tpu.pipeline_mode<synchronous>, transform_indices = @transform_1, window_bounds = array<i64: 14, 256>}, {pipeline_mode = #tpu.pipeline_mode<synchronous>, transform_indices = @transform_2, window_bounds = array<i64: 1, 256>}, {pipeline_mode = #tpu.pipeline_mode<synchronous>, transform_indices = @transform_3, window_bounds = array<i64: 256, 256>}, {pipeline_mode = #tpu.pipeline_mode<synchronous>, transform_indices = @transform_4, window_bounds = array<i64: 1, 256>}, {pipeline_mode = #tpu.pipeline_mode<synchronous>, transform_indices = @transform_5, window_bounds = array<i64: 256, 1>}, {pipeline_mode = #tpu.pipeline_mode<synchronous>, transform_indices = @transform_6, window_bounds = array<i64: 1, 1>}, {transform_indices = @transform_7, window_bounds = array<i64: 8, 1>}]} {
    %c0 = arith.constant 0 : index
    %c0_0 = arith.constant 0 : index
    %0 = vector.load %arg1[%c0, %c0_0] : memref<8x14xf32, #tpu.memory_space<vmem>>, vector<8x14xf32>
    %c0_1 = arith.constant 0 : index
    %c0_2 = arith.constant 0 : index
    %1 = vector.load %arg2[%c0_1, %c0_2] : memref<14x256xf32, #tpu.memory_space<vmem>>, vector<14x256xf32>
    %cst = arith.constant dense<0.000000e+00> : vector<8x256xf32>
    %2 = tpu.matmul %0, %1, %cst {dimension_numbers = #tpu.dot_dimension_numbers<[1], [0], [0], [1], [0, 0, 1, 1], [], []>} : vector<8x14xf32>, vector<14x256xf32>, vector<8x256xf32> -> vector<8x256xf32>
    %c0_3 = arith.constant 0 : index
    %c0_4 = arith.constant 0 : index
    %3 = vector.load %arg3[%c0_3, %c0_4] : memref<1x256xf32, #tpu.memory_space<vmem>>, vector<1x256xf32>
    %4 = vector.broadcast %3 : vector<1x256xf32> to vector<8x256xf32>
    %5 = arith.addf %2, %4 : vector<8x256xf32>
    %cst_5 = arith.constant 2.000000e+01 : f32
    %6 = vector.broadcast %cst_5 : f32 to vector<8x256xf32>
    %7 = arith.minimumf %5, %6 : vector<8x256xf32>
    %8 = math.exp %7 : vector<8x256xf32>
    %cst_6 = arith.constant 2.000000e+00 : f32
    %9 = vector.broadcast %cst_6 : f32 to vector<8x256xf32>
    %10 = arith.addf %8, %9 : vector<8x256xf32>
    %11 = arith.mulf %8, %10 : vector<8x256xf32>
    %cst_7 = arith.constant 2.000000e+00 : f32
    %12 = vector.broadcast %cst_7 : f32 to vector<8x256xf32>
    %13 = arith.addf %11, %12 : vector<8x256xf32>
    %14 = tpu.reciprocal %13 {approx = true} : vector<8x256xf32> -> vector<8x256xf32>
    %15 = arith.mulf %11, %14 : vector<8x256xf32>
    %cst_8 = arith.constant 2.000000e+01 : f32
    %16 = vector.broadcast %cst_8 : f32 to vector<8x256xf32>
    %17 = arith.cmpf ogt, %5, %16 : vector<8x256xf32>
    %18 = arith.mulf %5, %15 : vector<8x256xf32>
    %19 = arith.select %17, %5, %18 : vector<8x256xi1>, vector<8x256xf32>
    %c0_9 = arith.constant 0 : index
    %c0_10 = arith.constant 0 : index
    %20 = vector.load %arg4[%c0_9, %c0_10] : memref<256x256xf32, #tpu.memory_space<vmem>>, vector<256x256xf32>
    %cst_11 = arith.constant dense<0.000000e+00> : vector<8x256xf32>
    %21 = tpu.matmul %19, %20, %cst_11 {dimension_numbers = #tpu.dot_dimension_numbers<[1], [0], [0], [1], [0, 0, 1, 1], [], []>} : vector<8x256xf32>, vector<256x256xf32>, vector<8x256xf32> -> vector<8x256xf32>
    %c0_12 = arith.constant 0 : index
    %c0_13 = arith.constant 0 : index
    %22 = vector.load %arg5[%c0_12, %c0_13] : memref<1x256xf32, #tpu.memory_space<vmem>>, vector<1x256xf32>
    %23 = vector.broadcast %22 : vector<1x256xf32> to vector<8x256xf32>
    %24 = arith.addf %21, %23 : vector<8x256xf32>
    %cst_14 = arith.constant 2.000000e+01 : f32
    %25 = vector.broadcast %cst_14 : f32 to vector<8x256xf32>
    %26 = arith.minimumf %24, %25 : vector<8x256xf32>
    %27 = math.exp %26 : vector<8x256xf32>
    %cst_15 = arith.constant 2.000000e+00 : f32
    %28 = vector.broadcast %cst_15 : f32 to vector<8x256xf32>
    %29 = arith.addf %27, %28 : vector<8x256xf32>
    %30 = arith.mulf %27, %29 : vector<8x256xf32>
    %cst_16 = arith.constant 2.000000e+00 : f32
    %31 = vector.broadcast %cst_16 : f32 to vector<8x256xf32>
    %32 = arith.addf %30, %31 : vector<8x256xf32>
    %33 = tpu.reciprocal %32 {approx = true} : vector<8x256xf32> -> vector<8x256xf32>
    %34 = arith.mulf %30, %33 : vector<8x256xf32>
    %cst_17 = arith.constant 2.000000e+01 : f32
    %35 = vector.broadcast %cst_17 : f32 to vector<8x256xf32>
    %36 = arith.cmpf ogt, %24, %35 : vector<8x256xf32>
    %37 = arith.mulf %24, %34 : vector<8x256xf32>
    %38 = arith.select %36, %24, %37 : vector<8x256xi1>, vector<8x256xf32>
    %c0_18 = arith.constant 0 : index
    %c0_19 = arith.constant 0 : index
    %39 = vector.load %arg6[%c0_18, %c0_19] : memref<256x1xf32, #tpu.memory_space<vmem>>, vector<256x1xf32>
    %cst_20 = arith.constant dense<0.000000e+00> : vector<8x1xf32>
    %40 = tpu.matmul %38, %39, %cst_20 {dimension_numbers = #tpu.dot_dimension_numbers<[1], [0], [0], [1], [0, 0, 1, 1], [], []>} : vector<8x256xf32>, vector<256x1xf32>, vector<8x1xf32> -> vector<8x1xf32>
    %c0_21 = arith.constant 0 : index
    %c0_22 = arith.constant 0 : index
    %41 = vector.load %arg7[%c0_21, %c0_22] : memref<1x1xf32, #tpu.memory_space<vmem>>, vector<1x1xf32>
    %42 = vector.broadcast %41 : vector<1x1xf32> to vector<8x1xf32>
    %43 = arith.addf %40, %42 : vector<8x1xf32>
    %c0_23 = arith.constant 0 : index
    %c0_24 = arith.constant 0 : index
    %44 = vector.load %arg8[%c0_23, %c0_24] : memref<8x1xf32, #tpu.memory_space<vmem>>, vector<8x1xf32>
    tpu.vector_store %arg8[%c0_23, %c0_24], %43 {strides = array<i32>} : memref<8x1xf32, #tpu.memory_space<vmem>>, vector<8x1xf32>,
    return
  }
  func.func @transform_0(%arg0: i32) -> (i32, i32) {
    %c0_i32 = arith.constant 0 : i32
    %c0_i32_0 = arith.constant 0 : i32
    return %arg0, %c0_i32 : i32, i32
  }
  func.func @transform_1(%arg0: i32) -> (i32, i32) {
    %c0_i32 = arith.constant 0 : i32
    %c0_i32_0 = arith.constant 0 : i32
    %c0_i32_1 = arith.constant 0 : i32
    return %c0_i32, %c0_i32_0 : i32, i32
  }
  func.func @transform_2(%arg0: i32) -> (i32, i32) {
    %c0_i32 = arith.constant 0 : i32
    %c0_i32_0 = arith.constant 0 : i32
    %c0_i32_1 = arith.constant 0 : i32
    return %c0_i32, %c0_i32_0 : i32, i32
  }
  func.func @transform_3(%arg0: i32) -> (i32, i32) {
    %c0_i32 = arith.constant 0 : i32
    %c0_i32_0 = arith.constant 0 : i32
    %c0_i32_1 = arith.constant 0 : i32
    return %c0_i32, %c0_i32_0 : i32, i32
  }
  func.func @transform_4(%arg0: i32) -> (i32, i32) {
    %c0_i32 = arith.constant 0 : i32
    %c0_i32_0 = arith.constant 0 : i32
    %c0_i32_1 = arith.constant 0 : i32
    return %c0_i32, %c0_i32_0 : i32, i32
  }
  func.func @transform_5(%arg0: i32) -> (i32, i32) {
    %c0_i32 = arith.constant 0 : i32
    %c0_i32_0 = arith.constant 0 : i32
    %c0_i32_1 = arith.constant 0 : i32
    return %c0_i32, %c0_i32_0 : i32, i32
  }
  func.func @transform_6(%arg0: i32) -> (i32, i32) {
    %c0_i32 = arith.constant 0 : i32
    %c0_i32_0 = arith.constant 0 : i32
    %c0_i32_1 = arith.constant 0 : i32
    return %c0_i32, %c0_i32_0 : i32, i32
  }
  func.func @transform_7(%arg0: i32) -> (i32, i32) {
    %c0_i32 = arith.constant 0 : i32
    %c0_i32_0 = arith.constant 0 : i32
    return %arg0, %c0_i32 : i32, i32
  }
}

</mosaic_0001>

<bundles_post_ra>
// kernel: tpu_custom_call.1
= control target key start
LH: loop header
LB: loop body
LE: loop exit
PB: predicated region body
PF: predicated region fallthrough
CT: control target
= control target key end

     0   :  { %s711_s0 = inlined_call_operand.vmem [shape: f32[8,14], index: 0, kind: input, shape index: {}]   ;;  %s712_s1 = inlined_call_operand.vmem [shape: f32[14,256], index: 1, kind: input, shape index: {}]   ;;  %s713_s2 = inlined_call_operand.vmem [shape: f32[1,256], index: 2, kind: input, shape index: {}]   ;;  %s714_s3 = inlined_call_operand.hbm [shape: f32[256,256], index: 3, kind: input, shape index: {}]   ;;  %s715_s4 = inlined_call_operand.vmem [shape: f32[1,256], index: 4, kind: input, shape index: {}]   ;;  %s716_s5 = inlined_call_operand.vmem [shape: f32[256,1], index: 5, kind: input, shape index: {}]   ;;  %s717_s6 = inlined_call_operand.<no memory space> [shape: f32[1,1], index: 6, kind: input, shape index: {}]   ;;  %s718_s7 = inlined_call_operand.vmem [shape: f32[8,1], index: 7, kind: output, shape index: {}]  }
   0x1   :  { %v12_v0 = vstv %s717_s6 }
   0x2   :  { %13 = vst [vmem:[#allocation2] sm:$0x1] %v12_v0 }
   0x3   :  { %14 = vsyncpa [#allocation4], 0  ;;  %s529_s26 = smov [#allocation3]  }
   0x4   :  { %s26_s27 = sshll.u32 %s529_s26, 4  ;;  %s27_s27 = int_to_ptr.vmem [resolvable:$true] %s26_s27 }
   0x5   :  { %s515_s28 = scalar_lea.vmem %s27_s27, 8192  ;;  %p520_p1 = scmp.lt.s32.totalorder %s27_s27, %s27_s27 }
   0x6   :  { %p516_p0 = scmp.ne.s32.totalorder %s27_s27, %s515_s28  ;;  %p521_p2 = scmp.lt.s32.totalorder %s515_s28, %s515_s28 }
   0x8   :  { %p522_p3 = por %p521_p2, %p520_p1 }
   0xa   :  { %p523_p4 = pnand %p522_p3, %p516_p0 }
   0xc   :  { %526 = shalt.err (!%p523_p4)
}
   0xd   :  { %s530_s29 = smov 256   ;;  %s531_s30 = smov 16  }
   0xe   :  { %32 = dma.hbm_to_vmem [thread:$0]  %s714_s3, 8192, %s27_s27, [#allocation4], %s530_s29, %s530_s29, %s531_s30  }
   0xf   :  { %527 = dma.done.wait [#allocation4], 8192  }
  0x10   :  { %528 = vsyncadd [#allocation4], 4294959104  ;;  %v532_v1 = vmov 0.0   ;;  %vm63_vm0 = vcmask 1045504   ;;  %v46_v2 = vld [vmem:[%s712_s1 + $0x18] sm:$0x3f] }
  0x11   :  { %134 = vmatprep.mubr.f32.mxu0 %v532_v1  ;;  %v45_v3 = vld [vmem:[%s712_s1 + $0x10] sm:$0x3f]  ;;  %v44_v4 = vld [vmem:[%s712_s1 + $0x8] sm:$0xff]  ;;  %448 = vmatprep.subr.msk.mxu0 %vm63_vm0, %v46_v2  ;;  %v43_v5 = vld [vmem:[%s712_s1] sm:$0xff]  ;;  %vm59_vm1 = vcmask 113664   ;;  %vm441_vm6 = vcmask 7168  }
  0x12   :  { %v42_v6 = vld [vmem:[%s711_s0] sm:$0xff]  ;;  %449 = vmatpush1.msk.msra.mxu0 %vm63_vm0, %v45_v3  ;;  %v193_v8 = vld [vmem:[#allocation3 + $0xf0] sm:$0xff]  ;;  %v192_v9 = vld [vmem:[#allocation3 + $0xe8] sm:$0xff] }
  0x13   :  { %v194_v7 = vld [vmem:[#allocation3 + $0xf8] sm:$0xff]  ;;  %v191_v10 = vld [vmem:[#allocation3 + $0xe0] sm:$0xff]  ;;  %100 = vmatprep.subr.mxu0 %v44_v4  ;;  %v189_v12 = vld [vmem:[#allocation3 + $0xd0] sm:$0xff] }
  0x14   :  { %239 = vmatprep.subr.mxu1 %v194_v7  ;;  %v190_v11 = vld [vmem:[#allocation3 + $0xd8] sm:$0xff]  ;;  %101 = vmatpush1.msra.mxu0 %v43_v5  ;;  %v188_v13 = vld [vmem:[#allocation3 + $0xc8] sm:$0xff]  ;;  %v187_v14 = vld [vmem:[#allocation3 + $0xc0] sm:$0xff]  ;;  %v49_v7 = vlaneseq }
  0x15   :  { %240 = vmatpush1.msra.mxu1 %v193_v8  ;;  %450 = vmatmul.mubr.msk.f32.vlgmr.msra.gmra.mxu0 %vm59_vm1, %v42_v6  ;;  %v186_v15 = vld [vmem:[#allocation3 + $0xb8] sm:$0xff]  ;;  %v185_v16 = vld [vmem:[#allocation3 + $0xb0] sm:$0xff]  ;;  %v184_v17 = vld [vmem:[#allocation3 + $0xa8] sm:$0xff] }
  0x16   :  { %241 = vmatprep.subr.mxu1 %v192_v9  ;;  %v183_v18 = vld [vmem:[#allocation3 + $0xa0] sm:$0xff]  ;;  %v182_v19 = vld [vmem:[#allocation3 + $0x98] sm:$0xff]  ;;  %v181_v20 = vld [vmem:[#allocation3 + $0x90] sm:$0xff]  ;;  %v594_v8 = vshrl.u32 %v49_v7, 7 }
  0x17   :  { %242 = vmatpush1.msra.mxu1 %v191_v10  ;;  %v180_v21 = vld [vmem:[#allocation3 + $0x88] sm:$0xff]  ;;  %v179_v22 = vld [vmem:[#allocation3 + $0x80] sm:$0xff]  ;;  %v178_v23 = vld [vmem:[#allocation3 + $0x78] sm:$0xff] }
  0x18   :  { %243 = vmatprep.subr.mxu1 %v190_v11  ;;  %v177_v24 = vld [vmem:[#allocation3 + $0x70] sm:$0xff]  ;;  %v176_v25 = vld [vmem:[#allocation3 + $0x68] sm:$0xff]  ;;  %v175_v26 = vld [vmem:[#allocation3 + $0x60] sm:$0xff]  ;;  %v51_v9 = vsub.s32 0, %v594_v8  ;;  %v55_v11 = vsub.s32 1, %v594_v8 }
  0x19   :  { %244 = vmatpush1.msra.mxu1 %v189_v12  ;;  %v174_v27 = vld [vmem:[#allocation3 + $0x58] sm:$0xff]  ;;  %v173_v28 = vld [vmem:[#allocation3 + $0x50] sm:$0xff]  ;;  %v172_v29 = vld [vmem:[#allocation3 + $0x48] sm:$0xff] }
  0x1a   :  { %245 = vmatprep.subr.mxu1 %v188_v13  ;;  %v171_v30 = vld [vmem:[#allocation3 + $0x40] sm:$0xff]  ;;  %v170_v31 = vld [vmem:[#allocation3 + $0x38] sm:$0xff]  ;;  %v169_v32 = vld [vmem:[#allocation3 + $0x30] sm:$0xff] }
  0x1b   :  { %246 = vmatpush1.msra.mxu1 %v187_v14  ;;  %v168_v33 = vld [vmem:[#allocation3 + $0x28] sm:$0xff]  ;;  %v167_v34 = vld [vmem:[#allocation3 + $0x20] sm:$0xff]  ;;  %v166_v35 = vld [vmem:[#allocation3 + $0x18] sm:$0xff] }
  0x1c   :  { %247 = vmatprep.subr.mxu1 %v186_v15  ;;  %v165_v36 = vld [vmem:[#allocation3 + $0x10] sm:$0xff]  ;;  %v164_v37 = vld [vmem:[#allocation3 + $0x8] sm:$0xff]  ;;  %v163_v38 = vld [vmem:[#allocation3] sm:$0xff] }
  0x1d   :  { %248 = vmatpush1.msra.mxu1 %v185_v16  ;;  %v226_v39 = vld [vmem:[#allocation3 + $0x1f8] sm:$0xff]  ;;  %v225_v40 = vld [vmem:[#allocation3 + $0x1f0] sm:$0xff]  ;;  %v224_v41 = vld [vmem:[#allocation3 + $0x1e8] sm:$0xff] }
  0x1e   :  { %249 = vmatprep.subr.mxu1 %v184_v17  ;;  %v223_v42 = vld [vmem:[#allocation3 + $0x1e0] sm:$0xff]  ;;  %v222_v43 = vld [vmem:[#allocation3 + $0x1d8] sm:$0xff]  ;;  %v221_v44 = vld [vmem:[#allocation3 + $0x1d0] sm:$0xff] }
  0x1f   :  { %250 = vmatpush1.msra.mxu1 %v183_v18  ;;  %v220_v45 = vld [vmem:[#allocation3 + $0x1c8] sm:$0xff]  ;;  %v219_v46 = vld [vmem:[#allocation3 + $0x1c0] sm:$0xff]  ;;  %v218_v47 = vld [vmem:[#allocation3 + $0x1b8] sm:$0xff] }
  0x20   :  { %251 = vmatprep.subr.mxu1 %v182_v19  ;;  %v217_v48 = vld [vmem:[#allocation3 + $0x1b0] sm:$0xff]  ;;  %v216_v49 = vld [vmem:[#allocation3 + $0x1a8] sm:$0xff]  ;;  %v215_v50 = vld [vmem:[#allocation3 + $0x1a0] sm:$0xff] }
  0x21   :  { %252 = vmatpush1.msra.mxu1 %v181_v20  ;;  %v214_v51 = vld [vmem:[#allocation3 + $0x198] sm:$0xff]  ;;  %v213_v52 = vld [vmem:[#allocation3 + $0x190] sm:$0xff]  ;;  %v212_v53 = vld [vmem:[#allocation3 + $0x188] sm:$0xff] }
  0x22   :  { %253 = vmatprep.subr.mxu1 %v180_v21  ;;  %v211_v54 = vld [vmem:[#allocation3 + $0x180] sm:$0xff]  ;;  %v210_v55 = vld [vmem:[#allocation3 + $0x178] sm:$0xff]  ;;  %v209_v56 = vld [vmem:[#allocation3 + $0x170] sm:$0xff] }
  0x23   :  { %254 = vmatpush1.msra.mxu1 %v179_v22  ;;  %v208_v57 = vld [vmem:[#allocation3 + $0x168] sm:$0xff]  ;;  %v207_v58 = vld [vmem:[#allocation3 + $0x160] sm:$0xff]  ;;  %v206_v59 = vld [vmem:[#allocation3 + $0x158] sm:$0xff] }
  0x24   :  { %255 = vmatprep.subr.mxu1 %v178_v23  ;;  %v205_v60 = vld [vmem:[#allocation3 + $0x150] sm:$0xff]  ;;  %v204_v61 = vld [vmem:[#allocation3 + $0x148] sm:$0xff]  ;;  %v203_v62 = vld [vmem:[#allocation3 + $0x140] sm:$0xff] }
  0x25   :  { %256 = vmatpush1.msra.mxu1 %v177_v24  ;;  %v202_v63 = vld [vmem:[#allocation3 + $0x138] sm:$0xff]  ;;  %v201_v0 = vld [vmem:[#allocation3 + $0x130] sm:$0xff]  ;;  %v200_v1 = vld [vmem:[#allocation3 + $0x128] sm:$0xff] }
  0x26   :  { %257 = vmatprep.subr.mxu1 %v176_v25  ;;  %v199_v2 = vld [vmem:[#allocation3 + $0x120] sm:$0xff]  ;;  %v198_v3 = vld [vmem:[#allocation3 + $0x118] sm:$0xff]  ;;  %v197_v4 = vld [vmem:[#allocation3 + $0x110] sm:$0xff] }
  0x27   :  { %258 = vmatpush1.msra.mxu1 %v175_v26  ;;  %v196_v5 = vld [vmem:[#allocation3 + $0x108] sm:$0xff]  ;;  %v195_v6 = vld [vmem:[#allocation3 + $0x100] sm:$0xff] }
  0x28   :  { %259 = vmatprep.subr.mxu1 %v174_v27  ;;  %v47_v10 = vld [vmem:[%s713_s2] sm:$0x3] }
  0x29   :  { %260 = vmatpush1.msra.mxu1 %v173_v28  ;;  %v52_v12 = vrot.slane %v47_v10, %v51_v9  ;;  %v56_v13 = vrot.slane %v47_v10, %v55_v11 }
  0x2a   :  { %261 = vmatprep.subr.mxu1 %v172_v29 }
  0x2b   :  { %262 = vmatpush1.msra.mxu1 %v171_v30 }
  0x2c   :  { %263 = vmatprep.subr.mxu1 %v170_v31 }
  0x2d   :  { %264 = vmatpush1.msra.mxu1 %v169_v32 }
  0x2e   :  { %265 = vmatprep.subr.mxu1 %v168_v33 }
  0x2f   :  { %266 = vmatpush1.msra.mxu1 %v167_v34 }
  0x30   :  { %267 = vmatprep.subr.mxu1 %v166_v35 }
  0x31   :  { %268 = vmatpush1.msra.mxu1 %v165_v36 }
  0x32   :  { %269 = vmatprep.subr.mxu1 %v164_v37 }
  0x33   :  { %270 = vmatpush1.msra.mxu1 %v163_v38  ;;  %v363_v38 = vld [vmem:[%s716_s5 + $0xf8] sm:$0xff] }
  0x34   :  { %271 = vmatprep.subr.mxu1 %v226_v39  ;;  %v347_v39 = vld [vmem:[%s716_s5 + $0x78] sm:$0xff]  ;;  %452 = vmatprep.subr.mxu0 %v363_v38 }
  0x35   :  { %272 = vmatpush2.msra.mxu1 %v225_v40  ;;  %v362_v40 = vld [vmem:[%s716_s5 + $0xf0] sm:$0xff]  ;;  %453 = vmatpush3.msra.mxu0 %v347_v39 }
  0x36   :  { %273 = vmatprep.subr.mxu1 %v224_v41  ;;  %v346_v41 = vld [vmem:[%s716_s5 + $0x70] sm:$0xff]  ;;  %454 = vmatprep.subr.mxu0 %v362_v40 }
  0x37   :  { %274 = vmatpush2.msra.mxu1 %v223_v42  ;;  %v361_v42 = vld [vmem:[%s716_s5 + $0xe8] sm:$0xff]  ;;  %455 = vmatpush3.msra.mxu0 %v346_v41 }
  0x38   :  { %275 = vmatprep.subr.mxu1 %v222_v43  ;;  %v345_v43 = vld [vmem:[%s716_s5 + $0x68] sm:$0xff]  ;;  %456 = vmatprep.subr.mxu0 %v361_v42 }
  0x39   :  { %276 = vmatpush2.msra.mxu1 %v221_v44  ;;  %v360_v44 = vld [vmem:[%s716_s5 + $0xe0] sm:$0xff]  ;;  %457 = vmatpush3.msra.mxu0 %v345_v43 }
  0x3a   :  { %277 = vmatprep.subr.mxu1 %v220_v45  ;;  %v344_v45 = vld [vmem:[%s716_s5 + $0x60] sm:$0xff]  ;;  %458 = vmatprep.subr.mxu0 %v360_v44 }
  0x3b   :  { %278 = vmatpush2.msra.mxu1 %v219_v46  ;;  %v359_v46 = vld [vmem:[%s716_s5 + $0xd8] sm:$0xff]  ;;  %459 = vmatpush3.msra.mxu0 %v344_v45 }
  0x3c   :  { %279 = vmatprep.subr.mxu1 %v218_v47  ;;  %v343_v47 = vld [vmem:[%s716_s5 + $0x58] sm:$0xff]  ;;  %460 = vmatprep.subr.mxu0 %v359_v46 }
  0x3d   :  { %280 = vmatpush2.msra.mxu1 %v217_v48  ;;  %v358_v48 = vld [vmem:[%s716_s5 + $0xd0] sm:$0xff]  ;;  %461 = vmatpush3.msra.mxu0 %v343_v47 }
  0x3e   :  { %281 = vmatprep.subr.mxu1 %v216_v49  ;;  %v342_v49 = vld [vmem:[%s716_s5 + $0x50] sm:$0xff]  ;;  %462 = vmatprep.subr.mxu0 %v358_v48 }
  0x3f   :  { %282 = vmatpush2.msra.mxu1 %v215_v50  ;;  %v357_v50 = vld [vmem:[%s716_s5 + $0xc8] sm:$0xff]  ;;  %463 = vmatpush3.msra.mxu0 %v342_v49 }
  0x40   :  { %283 = vmatprep.subr.mxu1 %v214_v51  ;;  %v341_v51 = vld [vmem:[%s716_s5 + $0x48] sm:$0xff]  ;;  %464 = vmatprep.subr.mxu0 %v357_v50 }
  0x41   :  { %284 = vmatpush2.msra.mxu1 %v213_v52  ;;  %v356_v52 = vld [vmem:[%s716_s5 + $0xc0] sm:$0xff]  ;;  %465 = vmatpush3.msra.mxu0 %v341_v51 }
  0x42   :  { %285 = vmatprep.subr.mxu1 %v212_v53  ;;  %v340_v53 = vld [vmem:[%s716_s5 + $0x40] sm:$0xff]  ;;  %466 = vmatprep.subr.mxu0 %v356_v52 }
  0x43   :  { %286 = vmatpush2.msra.mxu1 %v211_v54  ;;  %v355_v54 = vld [vmem:[%s716_s5 + $0xb8] sm:$0xff]  ;;  %467 = vmatpush3.msra.mxu0 %v340_v53 }
  0x44   :  { %287 = vmatprep.subr.mxu1 %v210_v55  ;;  %v339_v55 = vld [vmem:[%s716_s5 + $0x38] sm:$0xff]  ;;  %468 = vmatprep.subr.mxu0 %v355_v54 }
  0x45   :  { %288 = vmatpush2.msra.mxu1 %v209_v56  ;;  %v354_v56 = vld [vmem:[%s716_s5 + $0xb0] sm:$0xff]  ;;  %469 = vmatpush3.msra.mxu0 %v339_v55 }
  0x46   :  { %289 = vmatprep.subr.mxu1 %v208_v57  ;;  %v338_v57 = vld [vmem:[%s716_s5 + $0x30] sm:$0xff]  ;;  %470 = vmatprep.subr.mxu0 %v354_v56 }
  0x47   :  { %290 = vmatpush2.msra.mxu1 %v207_v58  ;;  %v353_v58 = vld [vmem:[%s716_s5 + $0xa8] sm:$0xff]  ;;  %471 = vmatpush3.msra.mxu0 %v338_v57 }
  0x48   :  { %291 = vmatprep.subr.mxu1 %v206_v59  ;;  %v337_v59 = vld [vmem:[%s716_s5 + $0x28] sm:$0xff]  ;;  %472 = vmatprep.subr.mxu0 %v353_v58 }
  0x49   :  { %292 = vmatpush2.msra.mxu1 %v205_v60  ;;  %v352_v60 = vld [vmem:[%s716_s5 + $0xa0] sm:$0xff]  ;;  %473 = vmatpush3.msra.mxu0 %v337_v59 }
  0x4a   :  { %293 = vmatprep.subr.mxu1 %v204_v61  ;;  %v336_v61 = vld [vmem:[%s716_s5 + $0x20] sm:$0xff]  ;;  %474 = vmatprep.subr.mxu0 %v352_v60 }
  0x4b   :  { %294 = vmatpush2.msra.mxu1 %v203_v62  ;;  %v351_v62 = vld [vmem:[%s716_s5 + $0x98] sm:$0xff]  ;;  %475 = vmatpush3.msra.mxu0 %v336_v61 }
  0x4c   :  { %295 = vmatprep.subr.mxu1 %v202_v63  ;;  %v335_v63 = vld [vmem:[%s716_s5 + $0x18] sm:$0xff]  ;;  %476 = vmatprep.subr.mxu0 %v351_v62 }
  0x4d   :  { %296 = vmatpush2.msra.mxu1 %v201_v0  ;;  %v350_v0 = vld [vmem:[%s716_s5 + $0x90] sm:$0xff]  ;;  %477 = vmatpush3.msra.mxu0 %v335_v63 }
  0x4e   :  { %297 = vmatprep.subr.mxu1 %v200_v1  ;;  %v334_v1 = vld [vmem:[%s716_s5 + $0x10] sm:$0xff]  ;;  %478 = vmatprep.subr.mxu0 %v350_v0 }
  0x4f   :  { %298 = vmatpush2.msra.mxu1 %v199_v2  ;;  %v349_v2 = vld [vmem:[%s716_s5 + $0x88] sm:$0xff]  ;;  %479 = vmatpush3.msra.mxu0 %v334_v1 }
  0x50   :  { %299 = vmatprep.subr.mxu1 %v198_v3  ;;  %v333_v3 = vld [vmem:[%s716_s5 + $0x8] sm:$0xff]  ;;  %480 = vmatprep.subr.mxu0 %v349_v2 }
  0x51   :  { %300 = vmatpush2.msra.mxu1 %v197_v4  ;;  %v348_v4 = vld [vmem:[%s716_s5 + $0x80] sm:$0xff]  ;;  %481 = vmatpush3.msra.mxu0 %v333_v3 }
  0x52   :  { %301 = vmatprep.subr.mxu1 %v196_v5  ;;  %v332_v5 = vld [vmem:[%s716_s5] sm:$0xff]  ;;  %482 = vmatprep.subr.mxu0 %v348_v4 }
  0x53   :  { %302 = vmatpush2.msra.mxu1 %v195_v6  ;;  %483 = vmatpush3.msra.mxu0 %v332_v5  ;;  %v227_v6 = vld [vmem:[%s715_s4] sm:$0x3] }
  0x54   :  { %v232_v7 = vrot.slane %v227_v6, %v51_v9  ;;  %v236_v10 = vrot.slane %v227_v6, %v55_v11 }
  0xd5   :  { %v136_v14 = vpop.f32.mrf.mxu0 }
  0xd6   :  { %v137_v15 = vadd.f32 %v136_v14, %v52_v12 }
  0xd7   :  { %v138_v16 = vpop.f32.mrf.mxu0 }
  0xd8   :  { %v141_v17 = vmin.f32 %v137_v15, 20.0  ;;  %v139_v18 = vadd.f32 %v138_v16, %v56_v13  ;;  %vm157_vm3 = vcmp.gt.f32.partialorder %v137_v15, 20.0 }
  0xda   :  { %v143_v19 = vmul.f32 1.442695, %v141_v17  ;;  %v142_v20 = vmin.f32 %v139_v18, 20.0  ;;  %vm158_vm2 = vcmp.gt.f32.partialorder %v139_v18, 20.0 }
  0xdc   :  { %491 = vpow2.f32 %v143_v19  ;;  %v145_v21 = vmul.f32 1.442695, %v142_v20 }
  0xde   :  { %493 = vpow2.f32 %v145_v21 }
  0xe9   :  { %v492_v22 = vpop.eup %491 }
  0xea   :  { %v147_v23 = vadd.f32 2.0, %v492_v22 }
  0xeb   :  { %v494_v24 = vpop.eup %493 }
  0xec   :  { %v148_v25 = vadd.f32 2.0, %v494_v24  ;;  %v149_v26 = vmul.f32 %v492_v22, %v147_v23 }
  0xee   :  { %v150_v27 = vmul.f32 %v494_v24, %v148_v25  ;;  %v151_v28 = vadd.f32 2.0, %v149_v26 }
  0xf0   :  { %v152_v29 = vadd.f32 2.0, %v150_v27  ;;  %495 = vrcp.f32 %v151_v28 }
  0xf2   :  { %497 = vrcp.f32 %v152_v29 }
  0xfd   :  { %v496_v30 = vpop.eup %495 }
  0xfe   :  { %v155_v31 = vmul.f32 %v496_v30, %v149_v26 }
  0xff   :  { %v498_v32 = vpop.eup %497 }
 0x100   :  { %v156_v33 = vmul.f32 %v498_v32, %v150_v27  ;;  %v159_v34 = vmul.f32 %v155_v31, %v137_v15 }
 0x102   :  { %v160_v35 = vmul.f32 %v156_v33, %v139_v18  ;;  %v161_v37 = vsel %vm157_vm3, %v137_v15, %v159_v34  ;;  %v451_v34 = vld [vmem:[#allocation2] ss:$0 sm:$0xff] }
 0x104   :  { %v162_v36 = vsel %vm158_vm2, %v139_v18, %v160_v35 }
 0x105   :  { %303 = vmatprep.mubr.f32.mxu1 %v162_v36 }
 0x106   :  { %304 = vmatmul.mubr.f32.vlgmr.msra.gmra.mxu1 %v161_v37 }
 0x1c6   :  { %v305_v12 = vpop.f32.mrf.mxu1 }
 0x1c7   :  { %v306_v13 = vadd.f32 %v305_v12, %v232_v7 }
 0x1c8   :  { %v307_v14 = vpop.f32.mrf.mxu1 }
 0x1c9   :  { %v310_v15 = vmin.f32 %v306_v13, 20.0  ;;  %v308_v16 = vadd.f32 %v307_v14, %v236_v10  ;;  %vm326_vm5 = vcmp.gt.f32.partialorder %v306_v13, 20.0 }
 0x1cb   :  { %v312_v17 = vmul.f32 1.442695, %v310_v15  ;;  %v311_v18 = vmin.f32 %v308_v16, 20.0  ;;  %vm327_vm4 = vcmp.gt.f32.partialorder %v308_v16, 20.0 }
 0x1cd   :  { %499 = vpow2.f32 %v312_v17  ;;  %v314_v19 = vmul.f32 1.442695, %v311_v18 }
 0x1cf   :  { %501 = vpow2.f32 %v314_v19 }
 0x1da   :  { %v500_v20 = vpop.eup %499 }
 0x1db   :  { %v316_v21 = vadd.f32 2.0, %v500_v20 }
 0x1dc   :  { %v502_v22 = vpop.eup %501 }
 0x1dd   :  { %v317_v23 = vadd.f32 2.0, %v502_v22  ;;  %v318_v24 = vmul.f32 %v500_v20, %v316_v21 }
 0x1df   :  { %v319_v25 = vmul.f32 %v502_v22, %v317_v23  ;;  %v320_v9 = vadd.f32 2.0, %v318_v24 }
 0x1e1   :  { %v321_v26 = vadd.f32 2.0, %v319_v25  ;;  %503 = vrcp.f32 %v320_v9 }
 0x1e3   :  { %505 = vrcp.f32 %v321_v26 }
 0x1ee   :  { %v504_v8 = vpop.eup %503 }
 0x1ef   :  { %v324_v11 = vmul.f32 %v504_v8, %v318_v24 }
 0x1f0   :  { %v506_v27 = vpop.eup %505 }
 0x1f1   :  { %v325_v28 = vmul.f32 %v506_v27, %v319_v25  ;;  %v328_v29 = vmul.f32 %v324_v11, %v306_v13 }
 0x1f3   :  { %v329_v30 = vmul.f32 %v325_v28, %v308_v16  ;;  %v330_v32 = vsel %vm326_vm5, %v306_v13, %v328_v29 }
 0x1f5   :  { %v331_v31 = vsel %vm327_vm4, %v308_v16, %v329_v30 }
 0x1f6   :  { %435 = vmatprep.mubr.f32.mxu0 %v331_v31 }
 0x1f7   :  { %436 = vmatmul.mubr.f32.vlgmr.msra.gmra.mxu0 %v330_v32 }
 0x2b7   :  { %v484_v33 = vpop.f32.mrf.mxu0 }
 0x2b9   :  { %v485_v35 = vpop.f32.mrf.mxu0 }
 0x2ba   :  { %v486_v36 = vadd.f32 %v485_v35, %v484_v33 }
 0x2bc   :  { %v438_v37 = vadd.f32 %v486_v36, %v451_v34 }
 0x2be   :  { %442 = vst.msk [vmem:[%s718_s7] sm:$0xff] %vm441_vm6, %v438_v37 }
 0x2bf   :  { %447 = vsyncpa [#allocation4], 1 }

</bundles_post_ra>
